<compile_context>
chip_gen: v7x
topology: tpu7x:2x2x1
jax: 0.10.0
libtpu: 0.0.40
codegen_flags: <defaults>
</compile_context>

<pallas_src>
import functools

import jax
import jax.numpy as jnp
from jax.experimental import pallas as pl
from jax.experimental.pallas import tpu as pltpu


def _round_up(x, m):
    return ((x + m - 1) // m) * m


def _fused_mlp_kernel(x_ref, *rest, num_layers, ifsigmoid):
    """Whole MLP in one kernel body: chained MXU matmuls, activations in VMEM.

    rest = (w_0, b_0, w_1, b_1, ..., w_{L-1}, b_{L-1}, o_ref)
    Hidden feature dims are pre-padded to multiples of 128 (zero pads are
    mathematically inert); input / output feature dims are the true widths.
    """
    o_ref = rest[-1]
    params = rest[:-1]

    # bf16 MXU operands, f32 accumulation.
    h = x_ref[...].astype(jnp.bfloat16)
    for i in range(num_layers):
        w = params[2 * i][...]            # bf16 [d_i, d_{i+1}]
        b = params[2 * i + 1][...]        # f32  [1,  d_{i+1}], broadcasts over rows
        h = jnp.dot(h, w, preferred_element_type=jnp.float32) + b
        if i < num_layers - 1:
            h = jnp.maximum(h, 0.0).astype(jnp.bfloat16)
    if ifsigmoid:
        h = jax.nn.sigmoid(h)
    o_ref[...] = h.astype(o_ref.dtype)


def prepare_mlp_params(weights, biases):
    """ONE-TIME parameter prep (do NOT call per forward).

    Pads hidden feature dims to multiples of 128 and casts weights to bf16.
    Input and output feature dims keep their true widths so the activations
    are read / written from HBM unpadded.  Returns (flat_params, padded_dims).
    """
    d_in = weights[0].shape[0]
    d_out = weights[-1].shape[1]
    dims = [d_in] + [w.shape[1] for w in weights]
    pdims = [d_in] + [_round_up(d, 128) for d in dims[1:-1]] + [d_out]

    flat = []
    for i, (w, b) in enumerate(zip(weights, biases)):
        wp = (jnp.zeros((pdims[i], pdims[i + 1]), jnp.bfloat16)
              .at[: w.shape[0], : w.shape[1]].set(w.astype(jnp.bfloat16)))
        bpad = (jnp.zeros((1, pdims[i + 1]), jnp.float32)
                .at[0, : b.shape[0]].set(b))
        flat.extend([wp, bpad])
    return tuple(flat), tuple(pdims)


def mlp_forward(x, flat_params, pdims, ifsigmoid, *, block_b=512):
    """Full MLP forward as a single fused pallas_call.

    x: [B, d_in] f32 (true feature width, no padding);
    flat_params / pdims: output of prepare_mlp_params().
    Returns [B, d_out] f32.
    """
    num_layers = len(flat_params) // 2
    B, d_in = x.shape
    assert d_in == pdims[0], "x feature dim must match prepared params"
    d_out = pdims[-1]

    # Batch tiling: big tiles amortize per-grid-step overhead, but cap at
    # ~half the (row-padded) batch so there are >=2 grid steps whenever there
    # are enough rows -> the "parallel" axis can split across v7x's two TCs.
    bp = _round_up(B, 8)
    half = _round_up(pl.cdiv(bp, 2), 8)
    tile_b = min(block_b, max(8, half))
    bp = _round_up(bp, tile_b)
    grid = (bp // tile_b,)

    # Only the batch dim may need padding (no-op when B is already aligned);
    # feature dims are never padded in HBM.
    xp = x if bp == B else jnp.zeros((bp, d_in), x.dtype).at[:B].set(x)

    # BlockSpecs: x / out tiled over batch with TRUE feature widths (legal:
    # last block dim equals the full array dim).  Weights & biases use a
    # constant block index -> VMEM-resident across the whole grid; Buffered(1)
    # since the same block is revisited every step (no double buffer needed).
    in_specs = [pl.BlockSpec((tile_b, d_in), lambda i: (i, 0))]
    for li in range(num_layers):
        in_specs.append(
            pl.BlockSpec((pdims[li], pdims[li + 1]), lambda i: (0, 0),
                         pipeline_mode=pl.Buffered(1)))
        in_specs.append(
            pl.BlockSpec((1, pdims[li + 1]), lambda i: (0, 0),
                         pipeline_mode=pl.Buffered(1)))
    out_specs = pl.BlockSpec((tile_b, d_out), lambda i: (i, 0))

    kernel = functools.partial(
        _fused_mlp_kernel, num_layers=num_layers, ifsigmoid=ifsigmoid)

    # Advisory cost estimate for the (single) custom call.
    flops = 2 * bp * sum(pdims[i] * pdims[i + 1] for i in range(num_layers))
    bytes_accessed = (
        4 * bp * d_in                                               # x read (f32)
        + sum(int(p.size) * p.dtype.itemsize for p in flat_params)  # params
        + 4 * bp * d_out)                                           # out write (f32)
    transcendentals = bp * d_out if ifsigmoid else 0

    out = pl.pallas_call(
        kernel,
        out_shape=jax.ShapeDtypeStruct((bp, d_out), x.dtype),
        grid=grid,
        in_specs=in_specs,
        out_specs=out_specs,
        compiler_params=pltpu.CompilerParams(
            dimension_semantics=("parallel",),   # shard batch across TCs (v7x)
            vmem_limit_bytes=32 * 1024 * 1024,   # safe everywhere; usage << 1 MiB/step
        ),
        cost_estimate=pl.CostEstimate(
            flops=flops,
            transcendentals=transcendentals,
            bytes_accessed=bytes_accessed,
        ),
    )(xp, *flat_params)

    return out if bp == B else out[:B]


def init_mlp_params(key, input_dim, hidden_dim, output_dim, num_layers):
    """Deterministic synthetic params mirroring nn.Linear shapes.

    Stored as W: [in, out] (pre-transposed vs PyTorch's [out, in]), f32.
    """
    h = [hidden_dim] * (num_layers - 1)
    dims_in = [input_dim] + h
    dims_out = h + [output_dim]
    weights, biases = [], []
    for n, k in zip(dims_in, dims_out):
        key, kw, kb = jax.random.split(key, 3)
        bound = 1.0 / (n ** 0.5)  # matches PyTorch default Linear init range
        weights.append(jax.random.uniform(kw, (n, k), jnp.float32, -bound, bound))
        biases.append(jax.random.uniform(kb, (k,), jnp.float32, -bound, bound))
    return weights, biases


if __name__ == "__main__":
    # Small shapes consistent with the module: MLP(32, 64, 16, 3, ifsigmoid=True)
    input_dim, hidden_dim, output_dim, num_layers = 32, 64, 16, 3
    batch = 8
    ifsigmoid = True

    key = jax.random.PRNGKey(0)
    key, kx = jax.random.split(key)
    x = jax.random.normal(kx, (batch, input_dim), jnp.float32)

    weights, biases = init_mlp_params(
        key, input_dim, hidden_dim, output_dim, num_layers
    )

    # One-time parameter prep (padding + bf16 cast), hoisted out of the forward.
    flat_params, pdims = prepare_mlp_params(weights, biases)

    out = mlp_forward(x, flat_params, pdims, ifsigmoid)
    out = jax.block_until_ready(out)

    # Pure-JAX f32 reference (same math, no Pallas, no padding).
    ref = x
    for i, (w, b) in enumerate(zip(weights, biases)):
        ref = ref @ w + b
        if i < num_layers - 1:
            ref = jnp.maximum(ref, 0.0)
    if ifsigmoid:
        ref = jax.nn.sigmoid(ref)

    assert out.shape == (batch, output_dim)
    # bf16 MXU operands with f32 accumulation -> loosened tolerance vs f32 ref.
    assert jnp.allclose(out, ref, atol=2e-2, rtol=2e-2)

    print("KERNEL_OK")
</pallas_src>

<mosaic_0001>
module attributes {stable_mosaic.version = 11 : i64} {
  func.func @_fused_mlp_kernel(%arg0: i32, %arg1: memref<8x32xf32, #tpu.memory_space<vmem>>, %arg2: memref<32x128xbf16, #tpu.memory_space<vmem>>, %arg3: memref<1x128xf32, #tpu.memory_space<vmem>>, %arg4: memref<128x128xbf16, #tpu.memory_space<vmem>>, %arg5: memref<1x128xf32, #tpu.memory_space<vmem>>, %arg6: memref<128x16xbf16, #tpu.memory_space<vmem>>, %arg7: memref<1x16xf32, #tpu.memory_space<vmem>>, %arg8: memref<8x16xf32, #tpu.memory_space<vmem>>) attributes {dimension_semantics = [#tpu.dimension_semantics<parallel>], iteration_bounds = array<i64: 1>, scalar_prefetch = 0 : i64, scratch_operands = 0 : i64, tpu.core_type = #tpu.core_type<tc>, window_params = [{transform_indices = @transform_0, window_bounds = array<i64: 8, 32>}, {pipeline_mode = #tpu.pipeline_mode<synchronous>, transform_indices = @transform_1, window_bounds = array<i64: 32, 128>}, {pipeline_mode = #tpu.pipeline_mode<synchronous>, transform_indices = @transform_2, window_bounds = array<i64: 1, 128>}, {pipeline_mode = #tpu.pipeline_mode<synchronous>, transform_indices = @transform_3, window_bounds = array<i64: 128, 128>}, {pipeline_mode = #tpu.pipeline_mode<synchronous>, transform_indices = @transform_4, window_bounds = array<i64: 1, 128>}, {pipeline_mode = #tpu.pipeline_mode<synchronous>, transform_indices = @transform_5, window_bounds = array<i64: 128, 16>}, {pipeline_mode = #tpu.pipeline_mode<synchronous>, transform_indices = @transform_6, window_bounds = array<i64: 1, 16>}, {transform_indices = @transform_7, window_bounds = array<i64: 8, 16>}]} {
    %c0 = arith.constant 0 : index
    %c0_0 = arith.constant 0 : index
    %0 = vector.load %arg1[%c0, %c0_0] : memref<8x32xf32, #tpu.memory_space<vmem>>, vector<8x32xf32>
    %1 = arith.truncf %0 : vector<8x32xf32> to vector<8x32xbf16>
    %c0_1 = arith.constant 0 : index
    %c0_2 = arith.constant 0 : index
    %2 = vector.load %arg2[%c0_1, %c0_2] : memref<32x128xbf16, #tpu.memory_space<vmem>>, vector<32x128xbf16>
    %c0_3 = arith.constant 0 : index
    %c0_4 = arith.constant 0 : index
    %3 = vector.load %arg3[%c0_3, %c0_4] : memref<1x128xf32, #tpu.memory_space<vmem>>, vector<1x128xf32>
    %cst = arith.constant dense<0.000000e+00> : vector<8x128xf32>
    %4 = tpu.matmul %1, %2, %cst {dimension_numbers = #tpu.dot_dimension_numbers<[1], [0], [0], [1], [0, 0, 1, 1], [], []>} : vector<8x32xbf16>, vector<32x128xbf16>, vector<8x128xf32> -> vector<8x128xf32>
    %5 = vector.broadcast %3 : vector<1x128xf32> to vector<8x128xf32>
    %6 = arith.addf %4, %5 : vector<8x128xf32>
    %cst_5 = arith.constant 0.000000e+00 : f32
    %7 = vector.broadcast %cst_5 : f32 to vector<8x128xf32>
    %8 = arith.maximumf %6, %7 : vector<8x128xf32>
    %9 = arith.truncf %8 : vector<8x128xf32> to vector<8x128xbf16>
    %c0_6 = arith.constant 0 : index
    %c0_7 = arith.constant 0 : index
    %10 = vector.load %arg4[%c0_6, %c0_7] : memref<128x128xbf16, #tpu.memory_space<vmem>>, vector<128x128xbf16>
    %c0_8 = arith.constant 0 : index
    %c0_9 = arith.constant 0 : index
    %11 = vector.load %arg5[%c0_8, %c0_9] : memref<1x128xf32, #tpu.memory_space<vmem>>, vector<1x128xf32>
    %cst_10 = arith.constant dense<0.000000e+00> : vector<8x128xf32>
    %12 = tpu.matmul %9, %10, %cst_10 {dimension_numbers = #tpu.dot_dimension_numbers<[1], [0], [0], [1], [0, 0, 1, 1], [], []>} : vector<8x128xbf16>, vector<128x128xbf16>, vector<8x128xf32> -> vector<8x128xf32>
    %13 = vector.broadcast %11 : vector<1x128xf32> to vector<8x128xf32>
    %14 = arith.addf %12, %13 : vector<8x128xf32>
    %cst_11 = arith.constant 0.000000e+00 : f32
    %15 = vector.broadcast %cst_11 : f32 to vector<8x128xf32>
    %16 = arith.maximumf %14, %15 : vector<8x128xf32>
    %17 = arith.truncf %16 : vector<8x128xf32> to vector<8x128xbf16>
    %c0_12 = arith.constant 0 : index
    %c0_13 = arith.constant 0 : index
    %18 = vector.load %arg6[%c0_12, %c0_13] : memref<128x16xbf16, #tpu.memory_space<vmem>>, vector<128x16xbf16>
    %c0_14 = arith.constant 0 : index
    %c0_15 = arith.constant 0 : index
    %19 = vector.load %arg7[%c0_14, %c0_15] : memref<1x16xf32, #tpu.memory_space<vmem>>, vector<1x16xf32>
    %cst_16 = arith.constant dense<0.000000e+00> : vector<8x16xf32>
    %20 = tpu.matmul %17, %18, %cst_16 {dimension_numbers = #tpu.dot_dimension_numbers<[1], [0], [0], [1], [0, 0, 1, 1], [], []>} : vector<8x128xbf16>, vector<128x16xbf16>, vector<8x16xf32> -> vector<8x16xf32>
    %21 = vector.broadcast %19 : vector<1x16xf32> to vector<8x16xf32>
    %22 = arith.addf %20, %21 : vector<8x16xf32>
    %23 = arith.negf %22 : vector<8x16xf32>
    %24 = math.exp %23 : vector<8x16xf32>
    %cst_17 = arith.constant 1.000000e+00 : f32
    %25 = vector.broadcast %cst_17 : f32 to vector<8x16xf32>
    %26 = arith.addf %25, %24 : vector<8x16xf32>
    %27 = arith.divf %25, %26 : vector<8x16xf32>
    %c0_18 = arith.constant 0 : index
    %c0_19 = arith.constant 0 : index
    %28 = vector.load %arg8[%c0_18, %c0_19] : memref<8x16xf32, #tpu.memory_space<vmem>>, vector<8x16xf32>
    tpu.vector_store %arg8[%c0_18, %c0_19], %27 {strides = array<i32>} : memref<8x16xf32, #tpu.memory_space<vmem>>, vector<8x16xf32>,
    return
  }
  func.func @transform_0(%arg0: i32) -> (i32, i32) {
    %c0_i32 = arith.constant 0 : i32
    %c0_i32_0 = arith.constant 0 : i32
    return %arg0, %c0_i32 : i32, i32
  }
  func.func @transform_1(%arg0: i32) -> (i32, i32) {
    %c0_i32 = arith.constant 0 : i32
    %c0_i32_0 = arith.constant 0 : i32
    %c0_i32_1 = arith.constant 0 : i32
    return %c0_i32, %c0_i32_0 : i32, i32
  }
  func.func @transform_2(%arg0: i32) -> (i32, i32) {
    %c0_i32 = arith.constant 0 : i32
    %c0_i32_0 = arith.constant 0 : i32
    %c0_i32_1 = arith.constant 0 : i32
    return %c0_i32, %c0_i32_0 : i32, i32
  }
  func.func @transform_3(%arg0: i32) -> (i32, i32) {
    %c0_i32 = arith.constant 0 : i32
    %c0_i32_0 = arith.constant 0 : i32
    %c0_i32_1 = arith.constant 0 : i32
    return %c0_i32, %c0_i32_0 : i32, i32
  }
  func.func @transform_4(%arg0: i32) -> (i32, i32) {
    %c0_i32 = arith.constant 0 : i32
    %c0_i32_0 = arith.constant 0 : i32
    %c0_i32_1 = arith.constant 0 : i32
    return %c0_i32, %c0_i32_0 : i32, i32
  }
  func.func @transform_5(%arg0: i32) -> (i32, i32) {
    %c0_i32 = arith.constant 0 : i32
    %c0_i32_0 = arith.constant 0 : i32
    %c0_i32_1 = arith.constant 0 : i32
    return %c0_i32, %c0_i32_0 : i32, i32
  }
  func.func @transform_6(%arg0: i32) -> (i32, i32) {
    %c0_i32 = arith.constant 0 : i32
    %c0_i32_0 = arith.constant 0 : i32
    %c0_i32_1 = arith.constant 0 : i32
    return %c0_i32, %c0_i32_0 : i32, i32
  }
  func.func @transform_7(%arg0: i32) -> (i32, i32) {
    %c0_i32 = arith.constant 0 : i32
    %c0_i32_0 = arith.constant 0 : i32
    return %arg0, %c0_i32 : i32, i32
  }
}

</mosaic_0001>

<bundles_post_ra>
// kernel: tpu_custom_call.1
= control target key start
LH: loop header
LB: loop body
LE: loop exit
PB: predicated region body
PF: predicated region fallthrough
CT: control target
= control target key end

     0   :  { %12 = vsyncpa [#allocation3], 0  ;;  %s679_s0 = inlined_call_operand.hbm [shape: f32[8,32], index: 0, kind: input, shape index: {}]   ;;  %s680_s1 = inlined_call_operand.vmem [shape: bf16[32,128], index: 1, kind: input, shape index: {}]   ;;  %s681_s2 = inlined_call_operand.vmem [shape: f32[1,128], index: 2, kind: input, shape index: {}]   ;;  %s682_s3 = inlined_call_operand.vmem [shape: bf16[128,128], index: 3, kind: input, shape index: {}]   ;;  %s683_s4 = inlined_call_operand.vmem [shape: f32[1,128], index: 4, kind: input, shape index: {}]   ;;  %s684_s5 = inlined_call_operand.vmem [shape: bf16[128,16], index: 5, kind: input, shape index: {}]   ;;  %s685_s6 = inlined_call_operand.vmem [shape: f32[1,16], index: 6, kind: input, shape index: {}]   ;;  %s686_s7 = inlined_call_operand.hbm [shape: f32[8,16], index: 7, kind: output, shape index: {}]  }
   0x1   :  { %13 = vsyncpa [#allocation4], 0  ;;  %s524_s24 = smov [#allocation2]   ;;  %s476_s28 = scalar_lea.hbm %s679_s0, 128 }
   0x2   :  { %s20_s25 = sshll.u32 %s524_s24, 4  ;;  %p477_p0 = scmp.ne.s32.totalorder %s679_s0, %s476_s28  ;;  %s21_s25 = int_to_ptr.vmem [resolvable:$true] %s20_s25 }
   0x3   :  { %p480_p1 = scmp.lt.u32.totalorder %s476_s28, %s679_s0 }
   0x5   :  { %p482_p2 = pnand %p480_p1, %p477_p0 }
   0x7   :  { %485 = shalt.err (!%p482_p2)
}
   0x8   :  { %s486_s10 = scalar_lea.vmem %s21_s25, 128  ;;  %p491_p4 = scmp.lt.s32.totalorder %s21_s25, %s21_s25 }
   0x9   :  { %p487_p3 = scmp.ne.s32.totalorder %s21_s25, %s486_s10  ;;  %p492_p5 = scmp.lt.s32.totalorder %s486_s10, %s486_s10 }
   0xb   :  { %p493_p6 = por %p492_p5, %p491_p4 }
   0xd   :  { %p494_p7 = pnand %p493_p6, %p487_p3 }
   0xf   :  { %497 = shalt.err (!%p494_p7)
}
  0x10   :  { %23 = dma.hbm_to_vmem [thread:$0]  %s679_s0, 128, %s21_s25, [#allocation3]  }
  0x11   :  { %520 = dma.done.wait [#allocation3], 128  }
  0x12   :  { %521 = vsyncadd [#allocation3], 4294967168  ;;  %v525_v0 = vmov 0.0   ;;  %vm526_vm0 = vmmov 0   ;;  %v454_v1 = vld [vmem:[%s680_s1] sm:$0xff]   ;;  %v455_v2 = vld [vmem:[%s680_s1 + $0x8] sm:$0xff]  }
  0x13   :  { %402 = vmatprep.subr.bf16.mxu0 %v525_v0  ;;  %406 = vmatprep.mubr.msk.bf16.mxu0 %vm526_vm0, %v525_v0  ;;  %v40_v3 = vld [vmem:[#allocation2] sm:$0xff]  ;;  %v457_v6 = vld [vmem:[%s682_s3 + $0x8] sm:$0xff]   ;;  %vm65_vm1 = vcmask 261120   ;;  %v458_v7 = vld [vmem:[%s682_s3 + $0x10] sm:$0xff]   ;;  %vm341_vm2 = vcmask 130048  }
  0x14   :  { %410 = vmatprep.subr.bf16.mxu1 %v525_v0  ;;  %426 = vmatprep.mubr.msk.bf16.mxu1 %vm526_vm0, %v525_v0  ;;  %v456_v4 = vld [vmem:[%s682_s3] sm:$0xff]   ;;  %v41_v5 = vpack.c.bf16 %v40_v3, %v40_v3  ;;  %v459_v8 = vld [vmem:[%s682_s3 + $0x18] sm:$0xff]   ;;  %v461_v10 = vld [vmem:[%s682_s3 + $0x28] sm:$0xff]  }
  0x15   :  { %403 = vmatpush3.bf16.msra.mxu0 %v454_v1  ;;  %411 = vmatpush3.bf16.msra.mxu1 %v456_v4  ;;  %v460_v9 = vld [vmem:[%s682_s3 + $0x20] sm:$0xff]   ;;  %v462_v11 = vld [vmem:[%s682_s3 + $0x30] sm:$0xff]   ;;  %v463_v12 = vld [vmem:[%s682_s3 + $0x38] sm:$0xff]  }
  0x16   :  { %404 = vmatprep.subr.bf16.mxu0 %v525_v0  ;;  %412 = vmatprep.subr.bf16.mxu1 %v525_v0  ;;  %v464_v13 = vld [vmem:[%s684_s5] sm:$0xff]   ;;  %v465_v14 = vld [vmem:[%s684_s5 + $0x8] sm:$0xff]   ;;  %v466_v15 = vld [vmem:[%s684_s5 + $0x10] sm:$0xff]  }
  0x17   :  { %v467_v16 = vld [vmem:[%s684_s5 + $0x18] sm:$0xff]   ;;  %v468_v17 = vld [vmem:[%s684_s5 + $0x20] sm:$0xff]   ;;  %v469_v18 = vld [vmem:[%s684_s5 + $0x28] sm:$0xff]  }
  0x18   :  { %v358_v19 = vld [vmem:[%s681_s2] ss:$0 sm:$0xff]  ;;  %v470_v27 = vld [vmem:[%s684_s5 + $0x30] sm:$0xff]   ;;  %v471_v28 = vld [vmem:[%s684_s5 + $0x38] sm:$0xff]  }
  0x19   :  { %405 = vmatpush3.bf16.msra.mxu0 %v455_v2  ;;  %413 = vmatpush3.bf16.msra.mxu1 %v457_v6  ;;  %v362_v29 = vld [vmem:[%s683_s4] ss:$0 sm:$0xff]  ;;  %s527_s4 = smov [#allocation5]  }
  0x1a   :  { %430 = vmatprep.subr.bf16.mxu0 %v525_v0  ;;  %414 = vmatprep.subr.bf16.mxu1 %v525_v0  ;;  %v371_v37 = vld [vmem:[%s685_s6] ss:$0 sm:$0xff]  ;;  %s349_s5 = sshll.u32 %s527_s4, 4  ;;  %s350_s5 = int_to_ptr.vmem [resolvable:$true] %s349_s5 }
  0x1b   :  { %s498_s26 = scalar_lea.vmem %s350_s5, 128  ;;  %p503_p9 = scmp.lt.s32.totalorder %s350_s5, %s350_s5 }
  0x1c   :  { %407 = vmatmul.mubr.msk.bf16.vlgmr.msra.gmra.mrb[0].mxu0 %vm65_vm1, %v41_v5  ;;  %p499_p8 = scmp.ne.s32.totalorder %s350_s5, %s498_s26  ;;  %p504_p10 = scmp.lt.s32.totalorder %s498_s26, %s498_s26 }
  0x1d   :  { %446 = vmatprep.mubr.msk.bf16.mxu0 %vm526_vm0, %v525_v0  ;;  %415 = vmatpush3.bf16.msra.mxu1 %v458_v7 }
  0x1e   :  { %416 = vmatprep.subr.bf16.mxu1 %v525_v0  ;;  %431 = vmatpush3.bf16.msra.mxu0 %v464_v13  ;;  %p505_p11 = por %p504_p10, %p503_p9 }
  0x1f   :  { %432 = vmatprep.subr.bf16.mxu0 %v525_v0 }
  0x20   :  { %p506_p12 = pnand %p505_p11, %p499_p8 }
  0x21   :  { %417 = vmatpush3.bf16.msra.mxu1 %v459_v8 }
  0x22   :  { %418 = vmatprep.subr.bf16.mxu1 %v525_v0  ;;  %433 = vmatpush3.bf16.msra.mxu0 %v465_v14 }
  0x23   :  { %434 = vmatprep.subr.bf16.mxu0 %v525_v0 }
  0x25   :  { %419 = vmatpush3.bf16.msra.mxu1 %v460_v9 }
  0x26   :  { %420 = vmatprep.subr.bf16.mxu1 %v525_v0  ;;  %435 = vmatpush3.bf16.msra.mxu0 %v466_v15 }
  0x27   :  { %436 = vmatprep.subr.bf16.mxu0 %v525_v0 }
  0x29   :  { %421 = vmatpush3.bf16.msra.mxu1 %v461_v10 }
  0x2a   :  { %422 = vmatprep.subr.bf16.mxu1 %v525_v0  ;;  %437 = vmatpush3.bf16.msra.mxu0 %v467_v16 }
  0x2b   :  { %438 = vmatprep.subr.bf16.mxu0 %v525_v0 }
  0x2d   :  { %423 = vmatpush3.bf16.msra.mxu1 %v462_v11 }
  0x2e   :  { %424 = vmatprep.subr.bf16.mxu1 %v525_v0  ;;  %439 = vmatpush3.bf16.msra.mxu0 %v468_v17 }
  0x2f   :  { %440 = vmatprep.subr.bf16.mxu0 %v525_v0 }
  0x31   :  { %425 = vmatpush3.bf16.msra.mxu1 %v463_v12 }
  0x32   :  { %441 = vmatpush3.bf16.msra.mxu0 %v469_v18 }
  0x33   :  { %442 = vmatprep.subr.bf16.mxu0 %v525_v0 }
  0x36   :  { %443 = vmatpush3.bf16.msra.mxu0 %v470_v27 }
  0x37   :  { %444 = vmatprep.subr.bf16.mxu0 %v525_v0 }
  0x3a   :  { %445 = vmatpush3.bf16.msra.mxu0 %v471_v28 }
  0xef   :  { %v103_v20 = vpop.f32.mrb[0].mxu0 }
  0xf0   :  { %v104_v21 = vadd.f32 %v358_v19, %v103_v20  ;;  %v408_v22 = vpop.f32.mrb[1].mxu0 }
  0xf1   :  { %v106_v23 = vpop.f32.mrb[2].mxu0 }
  0xf2   :  { %v109_v24 = vmax.f32 %v104_v21, 0.0  ;;  %v409_v25 = vpop.f32.mrb[3].mxu0 }
  0xf4   :  { %v110_v26 = vpack.c.bf16 %v109_v24, %v109_v24 }
  0xf6   :  { %427 = vmatmul.mubr.bf16.vlgmr.msra.gmra.mrb[0].mxu1 %v110_v26 }
 0x1c9   :  { %v216_v30 = vpop.f32.mrb[0].mxu1 }
 0x1ca   :  { %v217_v31 = vadd.f32 %v362_v29, %v216_v30  ;;  %v428_v32 = vpop.f32.mrb[1].mxu1 }
 0x1cb   :  { %v219_v33 = vpop.f32.mrb[2].mxu1 }
 0x1cc   :  { %v222_v34 = vmax.f32 %v217_v31, 0.0  ;;  %v429_v35 = vpop.f32.mrb[3].mxu1 }
 0x1ce   :  { %v223_v36 = vpack.c.bf16 %v222_v34, %v222_v34 }
 0x1d0   :  { %447 = vmatmul.mubr.bf16.vlgmr.msra.gmra.mrb[4].mxu0 %v223_v36 }
 0x2a3   :  { %v329_v38 = vpop.f32.mrb[4].mxu0 }
 0x2a4   :  { %v330_v39 = vadd.f32 %v371_v37, %v329_v38  ;;  %v448_v40 = vpop.f32.mrb[5].mxu0 }
 0x2a5   :  { %v332_v41 = vpop.f32.mrb[6].mxu0 }
 0x2a6   :  { %v380_v42 = vmul.f32 -1.442695, %v330_v39  ;;  %v449_v43 = vpop.f32.mrb[7].mxu0 }
 0x2a8   :  { %472 = vpow2.f32 %v380_v42 }
 0x2b2   :  { %v473_v44 = vpop.eup %472 }
 0x2b3   :  { %v338_v45 = vadd.f32 1.0, %v473_v44 }
 0x2b5   :  { %474 = vrcp.f32 %v338_v45 }
 0x2bf   :  { %v475_v46 = vpop.eup %474 }
 0x2c0   :  { %342 = vst.msk [vmem:[#allocation5] sm:$0xff] %vm341_vm2, %v475_v46 }
 0x2c1   :  { %509 = shalt.err (!%p506_p12)
}
 0x2c2   :  { %s510_s28 = scalar_lea.hbm %s686_s7, 128 }
 0x2c3   :  { %p511_p13 = scmp.ne.s32.totalorder %s686_s7, %s510_s28  ;;  %p514_p0 = scmp.lt.u32.totalorder %s510_s28, %s686_s7 }
 0x2c5   :  { %p516_p1 = pnand %p514_p0, %p511_p13 }
 0x2c7   :  { %519 = shalt.err (!%p516_p1)
}
 0x2c8   :  { %352 = dma.vmem_to_hbm [thread:$0]  %s350_s5, 128, %s686_s7, [#allocation4]  }
 0x2c9   :  { %522 = dma.done.wait [#allocation4], 128  }
 0x2ca   :  { %523 = vsyncadd [#allocation4], 4294967168 }
 0x2cb   :  { %356 = vsyncpa [#allocation3], 1 }
 0x2cc   :  { %357 = vsyncpa [#allocation4], 1 }

</bundles_post_ra>
